<compile_context>
chip_gen: v7x
topology: tpu7x:2x2x1
jax: 0.10.0
libtpu: 0.0.40
codegen_flags: <defaults>
</compile_context>

<pallas_src>
import functools

import jax
import jax.numpy as jnp
from jax.experimental import pallas as pl
from jax.experimental.pallas import tpu as pltpu


def _vdrop_kernel(seed_ref, x_ref, o_ref, *, p):
    # x_ref / o_ref are (TB, TS, H) tiles. Grid axis 0 = batch-block,
    # grid axis 1 = sequence tile. The mask below depends only on
    # (seed, global batch index, hidden index) -> identical for every seq
    # tile of a given batch row ("shared over S").
    TB, _, H = x_ref.shape
    bb = pl.program_id(0)  # batch-block index

    # ---- per-(batch, hidden) uniform bits via a murmur3-style finalizer ----
    h_idx = jax.lax.broadcasted_iota(jnp.int32, (TB, 1, H), 2).astype(jnp.uint32)
    b_idx = jax.lax.broadcasted_iota(jnp.int32, (TB, 1, H), 0).astype(jnp.uint32)
    b_idx = b_idx + (bb * TB).astype(jnp.uint32)  # global batch index
    key = seed_ref[0].astype(jnp.uint32) + b_idx * jnp.uint32(0x9E3779B9)
    v = h_idx ^ key
    v = (v ^ (v >> jnp.uint32(16))) * jnp.uint32(0x85EBCA6B)
    v = (v ^ (v >> jnp.uint32(13))) * jnp.uint32(0xC2B2AE35)
    v = v ^ (v >> jnp.uint32(16))

    # Integer threshold compare: P(keep) = 1 - p, quantized to 2^-24
    # (intentional, documented deviation from an exact Bernoulli).
    threshold = jnp.uint32(int(round(p * float(1 << 24))))
    keep = (v & jnp.uint32(0x00FFFFFF)) >= threshold            # (TB, 1, H)

    # Inverted-dropout scale in f32; multiply in f32 and cast on store so
    # low-precision dtypes get an f32-accurate scale (free under HBM bound).
    scale = jnp.float32(1.0 / (1.0 - p))
    mask = jnp.where(keep, scale, jnp.float32(0.0))             # (TB, 1, H)

    o_ref[...] = (x_ref[...].astype(jnp.float32) * mask).astype(o_ref.dtype)


def _per_buffer_budget_bytes():
    """Per-block byte budget, derived from physical VMEM (generation aware)."""
    try:
        vmem = int(pltpu.get_tpu_info().vmem_capacity_bytes)
    except Exception:  # pragma: no cover - conservative fallback (v7x: 64 MiB)
        vmem = 64 << 20
    # 4 live buffers (in + out, double-buffered) should use <= ~1/4 of
    # physical VMEM -> per-buffer budget = vmem/16, clamped to [1, 4] MiB.
    # v7x (64 MiB) -> 4 MiB; v5e/v6e (128 MiB) -> 4 MiB; tiny fallback -> 1 MiB.
    return int(min(4 << 20, max(1 << 20, vmem // 16)))


def _pick_tiles(B, S, H, itemsize, budget_bytes, min_grid_steps=8):
    """Choose (TB, TS): batch rows and sequence rows per block."""
    row_bytes = H * itemsize
    budget_rows = max(1, budget_bytes // row_bytes)
    total_rows = B * S
    # Cap block size so the grid keeps >= min_grid_steps steps when the
    # tensor is large enough (pipelining / v7x two-TC sharding), but never
    # go below 8 rows (sublane granularity).
    target_rows = min(budget_rows, max(8, pl.cdiv(total_rows, min_grid_steps)))

    if target_rows >= S:
        # Whole sequence fits in one block -> block over multiple batches.
        TS = S
        TB = max(1, min(B, target_rows // S))
        for cand in range(TB, 0, -1):          # prefer TB dividing B
            if B % cand == 0:
                TB = cand
                break
    else:
        TB = 1
        if S <= 8:
            TS = S
        else:
            TS = max(8, (target_rows // 8) * 8)
            TS = min(TS, S)
            # Prefer a TS that divides S (no ragged/masked last tile), but do
            # not shrink below half the budgeted size to find one.
            for cand in range(TS, max(8, TS // 2) - 1, -8):
                if S % cand == 0:
                    TS = cand
                    break
    return TB, TS


def variational_dropout(x, seed, p, training=True, donate_x=False):
    """x: (B, S, H). seed: int. Returns x * mask with the mask shared over S."""
    if not training or p <= 0.0:
        return x
    if p >= 1.0:
        raise ValueError(f"dropout probability must be in [0, 1), got {p}")

    B, S, H = x.shape
    itemsize = jnp.dtype(x.dtype).itemsize

    budget = _per_buffer_budget_bytes()
    TB, TS = _pick_tiles(B, S, H, itemsize, budget)
    block_bytes = TB * TS * H * itemsize

    grid = (pl.cdiv(B, TB), pl.cdiv(S, TS))
    seed_arr = jnp.asarray([seed], dtype=jnp.int32)
    kernel = functools.partial(_vdrop_kernel, p=float(p))

    # NOTE: the hidden axis must NOT be tiled (block H == H); the in-kernel
    # hidden iota is tile-local and relies on covering all of H in one block.
    block_shape = (TB, TS, H)

    return pl.pallas_call(
        kernel,
        out_shape=jax.ShapeDtypeStruct((B, S, H), x.dtype),
        grid_spec=pltpu.PrefetchScalarGridSpec(
            num_scalar_prefetch=1,
            grid=grid,
            in_specs=[
                pl.BlockSpec(block_shape, lambda bi, si, seed_ref: (bi, si, 0)),
            ],
            out_specs=pl.BlockSpec(block_shape, lambda bi, si, seed_ref: (bi, si, 0)),
        ),
        compiler_params=pltpu.CompilerParams(
            # Every tile is independent (mask derives from (seed, b, h) only),
            # so both axes can be sharded across v7x's two TensorCores.
            dimension_semantics=("parallel", "parallel"),
            # in + out, double-buffered, plus a few MiB of headroom.
            vmem_limit_bytes=int(4 * block_bytes + (8 << 20)),
        ),
        cost_estimate=pl.CostEstimate(
            flops=B * S * H,
            transcendentals=0,
            bytes_accessed=2 * B * S * H * itemsize,
        ),
        # Optional donation: x aliases the output (index 1: seed is input 0).
        input_output_aliases=({1: 0} if donate_x else {}),
    )(seed_arr, x)


if __name__ == "__main__":
    key = jax.random.PRNGKey(0)
    B, S, H = 2, 8, 128
    x = jax.random.normal(key, (B, S, H), dtype=jnp.float32)

    p = 0.3
    out = variational_dropout(x, seed=0, p=p, training=True)
    out = jax.block_until_ready(out)

    assert out.shape == x.shape and out.dtype == x.dtype

    # Every element is either dropped (0) or scaled by 1/(1-p).
    scaled = x / (1.0 - p)
    is_zero = jnp.isclose(out, 0.0)
    is_scaled = jnp.isclose(out, scaled, rtol=1e-5, atol=1e-6)
    assert bool(jnp.all(is_zero | is_scaled))

    # Mask is shared across the sequence axis (same keep pattern for all s).
    kept = ~is_zero
    assert bool(jnp.all(kept == kept[:, :1, :]))

    # Eval / p=0 path is identity.
    assert bool(jnp.all(variational_dropout(x, seed=0, p=p, training=False) == x))

    # Low-precision path: f32 compute, cast on store; mask still shared over S.
    x_bf16 = x.astype(jnp.bfloat16)
    out_bf16 = jax.block_until_ready(
        variational_dropout(x_bf16, seed=7, p=p, training=True))
    assert out_bf16.shape == x_bf16.shape and out_bf16.dtype == jnp.bfloat16
    kept_bf16 = out_bf16.astype(jnp.float32) != 0.0
    assert bool(jnp.all(kept_bf16 == kept_bf16[:, :1, :]))

    print("KERNEL_OK")
</pallas_src>

<mosaic_0001>
module attributes {stable_mosaic.version = 11 : i64} {
  func.func @_vdrop_kernel(%arg0: i32, %arg1: i32, %arg2: memref<1xi32, #tpu.memory_space<smem>>, %arg3: memref<1x8x128xf32, #tpu.memory_space<vmem>>, %arg4: memref<1x8x128xf32, #tpu.memory_space<vmem>>) attributes {dimension_semantics = [#tpu.dimension_semantics<parallel>, #tpu.dimension_semantics<parallel>], iteration_bounds = array<i64: 2, 1>, scalar_prefetch = 1 : i64, scratch_operands = 0 : i64, tpu.core_type = #tpu.core_type<tc>, window_params = [{transform_indices = @transform_0, window_bounds = array<i64: 1, 8, 128>}, {transform_indices = @transform_1, window_bounds = array<i64: 1, 8, 128>}]} {
    %0 = tpu.iota {dimensions = array<i32: 2>} : vector<1x1x128xi32>
    %1 = tpu.iota {dimensions = array<i32: 0>} : vector<1x1x128xi32>
    %c1_i32 = arith.constant 1 : i32
    %2 = arith.muli %arg0, %c1_i32 : i32
    %3 = vector.broadcast %2 : i32 to vector<1x1x128xi32>
    %4 = arith.addi %1, %3 : vector<1x1x128xi32>
    %c0 = arith.constant 0 : index
    %5 = memref.load %arg2[%c0] : memref<1xi32, #tpu.memory_space<smem>>
    %c-1640531527_i32 = arith.constant -1640531527 : i32
    %6 = vector.broadcast %c-1640531527_i32 : i32 to vector<1x1x128xi32>
    %7 = arith.muli %4, %6 : vector<1x1x128xi32>
    %8 = vector.broadcast %5 : i32 to vector<1x1x128xi32>
    %9 = arith.addi %8, %7 : vector<1x1x128xi32>
    %10 = arith.xori %0, %9 : vector<1x1x128xi32>
    %c16_i32 = arith.constant 16 : i32
    %11 = vector.broadcast %c16_i32 : i32 to vector<1x1x128xi32>
    %12 = arith.shrui %10, %11 : vector<1x1x128xi32>
    %13 = arith.xori %10, %12 : vector<1x1x128xi32>
    %c-2048144789_i32 = arith.constant -2048144789 : i32
    %14 = vector.broadcast %c-2048144789_i32 : i32 to vector<1x1x128xi32>
    %15 = arith.muli %13, %14 : vector<1x1x128xi32>
    %c13_i32 = arith.constant 13 : i32
    %16 = vector.broadcast %c13_i32 : i32 to vector<1x1x128xi32>
    %17 = arith.shrui %15, %16 : vector<1x1x128xi32>
    %18 = arith.xori %15, %17 : vector<1x1x128xi32>
    %c-1028477387_i32 = arith.constant -1028477387 : i32
    %19 = vector.broadcast %c-1028477387_i32 : i32 to vector<1x1x128xi32>
    %20 = arith.muli %18, %19 : vector<1x1x128xi32>
    %c16_i32_0 = arith.constant 16 : i32
    %21 = vector.broadcast %c16_i32_0 : i32 to vector<1x1x128xi32>
    %22 = arith.shrui %20, %21 : vector<1x1x128xi32>
    %23 = arith.xori %20, %22 : vector<1x1x128xi32>
    %c16777215_i32 = arith.constant 16777215 : i32
    %24 = vector.broadcast %c16777215_i32 : i32 to vector<1x1x128xi32>
    %25 = arith.andi %23, %24 : vector<1x1x128xi32>
    %c5033165_i32 = arith.constant 5033165 : i32
    %26 = vector.broadcast %c5033165_i32 : i32 to vector<1x1x128xi32>
    %27 = arith.cmpi uge, %25, %26 : vector<1x1x128xi32>
    %cst = arith.constant 1.42857146 : f32
    %cst_1 = arith.constant 0.000000e+00 : f32
    %28 = vector.broadcast %cst : f32 to vector<1x1x128xf32>
    %29 = vector.broadcast %cst_1 : f32 to vector<1x1x128xf32>
    %30 = arith.select %27, %28, %29 : vector<1x1x128xi1>, vector<1x1x128xf32>
    %c0_2 = arith.constant 0 : index
    %c0_3 = arith.constant 0 : index
    %c0_4 = arith.constant 0 : index
    %31 = vector.load %arg3[%c0_2, %c0_3, %c0_4] : memref<1x8x128xf32, #tpu.memory_space<vmem>>, vector<1x8x128xf32>
    %32 = vector.broadcast %30 : vector<1x1x128xf32> to vector<1x8x128xf32>
    %33 = arith.mulf %31, %32 : vector<1x8x128xf32>
    %c0_5 = arith.constant 0 : index
    %c0_6 = arith.constant 0 : index
    %c0_7 = arith.constant 0 : index
    %34 = vector.load %arg4[%c0_5, %c0_6, %c0_7] : memref<1x8x128xf32, #tpu.memory_space<vmem>>, vector<1x8x128xf32>
    tpu.vector_store %arg4[%c0_5, %c0_6, %c0_7], %33 {strides = array<i32>} : memref<1x8x128xf32, #tpu.memory_space<vmem>>, vector<1x8x128xf32>,
    return
  }
  func.func @transform_0(%arg0: i32, %arg1: i32, %arg2: memref<1xi32, #tpu.memory_space<smem>>) -> (i32, i32, i32) {
    %c0_i32 = arith.constant 0 : i32
    %c0_i32_0 = arith.constant 0 : i32
    return %arg0, %arg1, %c0_i32 : i32, i32, i32
  }
  func.func @transform_1(%arg0: i32, %arg1: i32, %arg2: memref<1xi32, #tpu.memory_space<smem>>) -> (i32, i32, i32) {
    %c0_i32 = arith.constant 0 : i32
    %c0_i32_0 = arith.constant 0 : i32
    return %arg0, %arg1, %c0_i32 : i32, i32, i32
  }
}

</mosaic_0001>

<bundles_post_ra>
// kernel: tpu_custom_call.1
= control target key start
LH: loop header
LB: loop body
LE: loop exit
PB: predicated region body
PF: predicated region fallthrough
CT: control target
= control target key end

     0   :  { %s652_s0 = inlined_call_operand.<no memory space> [shape: s32[1], index: 0, kind: input, shape index: {}]   ;;  %s653_s1 = inlined_call_operand.hbm [shape: f32[2,8,128], index: 1, kind: input, shape index: {}]   ;;  %s654_s2 = inlined_call_operand.hbm [shape: f32[2,8,128], index: 2, kind: output, shape index: {}]  }
   0x1   :  { %7 = sst [smem:[#allocation3]] %s652_s0 }
   0x2   :  { %8 = vsyncpa [#allocation5], 0 }
   0x3   :  { %10 = vsyncpa [#allocation5 + $0x1], 0 }
   0x4   :  { %11 = vsyncpa [#allocation6], 0 }
   0x5   :  { %13 = vsyncpa [#allocation6 + $0x1], 0  ;;  %s479_s11 = smov 0   ;;  %s481_s12 = smov 0  }
   0x6   :  { %s483_s13 = smov 0   ;;  %s485_s14 = smov 0  }
   0x7   :  { %s487_s15 = smov 0   ;;  %s489_s16 = smov 0  }
   0x8 LB: > { %s268_s0 = sadd.s32 4294967295, %s456_s16   ;;  %s269_s17 = sadd.s32 4294967294, %s456_s16   ;;  %s456_s16 = sphi %s489_s16, %s19_s16   ;;  %s452_s15 = sphi %s487_s15, %s670_s15   ;;  %s448_s14 = sphi %s485_s14, %s669_s14   ;;  %s444_s13 = sphi %s483_s13, %s668_s13   ;;  %s440_s12 = sphi %s481_s12, %s667_s12   ;;  %s436_s11 = sphi %s479_s11, %s666_s11  }
   0x9   : > { %s31_s18 = sadd.s32 1, %s452_s15  ;;  %s40_s19 = sadd.s32 1, %s444_s13 }
   0xa   : > { %p33_p0 = scmp.ge.s32.totalorder %s31_s18, 2  ;;  %p47_p1 = scmp.ne.s32.totalorder %s444_s13, %s440_s12 }
   0xb   : > { %p48_p2 = scmp.eq.s32.totalorder %s456_s16, 0  ;;  %p53_p3 = scmp.ne.s32.totalorder %s440_s12, %s436_s11 }
   0xc   : > { %s672_s18 = smov (%p33_p0, %s31_s18), 0  ;;  %p54_p5 = scmp.eq.s32.totalorder %s268_s0, 0 }
   0xd   : > { %p520_p4 = por %p48_p2, %p47_p1  ;;  %s35_s21 = ssub.s32 %s452_s15, %s672_s18 }
   0xe   : > { %p79_p6 = scmp.eq.s32.totalorder %s268_s0, 1  ;;  %p38_p7 = scmp.eq.s32.totalorder %s35_s21, 0 }
   0xf   : > { %p526_p8 = por %p54_p5, %p53_p3  ;;  %p85_p10 = scmp.eq.s32.totalorder %s269_s17, 1 }
  0x10   : > { %p530_p9 = por %p79_p6, %p47_p1  ;;  %p293_p13 = scmp.lt.s32.totalorder %s456_s16, 2 }
  0x11   : > { %s535_s24 = scalar_select %p38_p7, %s444_s13, %s40_s19  }
  0x12   : > { %s658_s23 = scalar_select %p530_p9, 1, 0 }
  0x13   : > { %p537_p11 = por %p85_p10, %p53_p3  ;;  %s105_s26 = sand.u32 1, %s444_s13  }
  0x14   : > { %s272_s27 = sshll.u32 %s105_s26, 3  ;;  %s273_s28 = sshll.u32 %s452_s15, 7 }
  0x15   : > { %s659_s25 = scalar_select %p537_p11, 1, 0 }
  0x16   : > { %s548_s3 = scalar_lea.hbm %s653_s1, %s273_s28  ;;  %s109_s4 = scalar_lea.vmem [#allocation4], %s272_s27 }
  0x17   : > { %s117_s5 = sshll.u32 %s109_s4, 4  ;;  %p554_p0 = pnand %p293_p13, %p520_p4  ;;  %s550_s5 = int_to_ptr.vmem [resolvable:$true] %s117_s5 }
  0x18   : > { %s106_s7 = scalar_lea.sflag [#allocation5], %s105_s26  ;;  %s344_s8 = scalar_lea.hbm %s548_s3, 128 }
  0x19   : > { %p345_p3 = scmp.ne.s32.totalorder %s548_s3, %s344_s8  ;;  %p346_p5 = pneg %p554_p0 }
  0x1a   : > { %s349_s0 = scalar_lea.hbm %s653_s1, 256  ;;  %p350_p4 = scmp.lt.u32.totalorder %s548_s3, %s653_s1 }
  0x1b   : > { %p347_p6 = pnand %p346_p5, %p345_p3  ;;  %p351_p10 = scmp.lt.u32.totalorder %s349_s0, %s344_s8 }
  0x1c   : > { %p353_p12 = scmp.lt.u32.totalorder %s344_s8, %s548_s3 }
  0x1d   : > { %p348_p7 = pneg %p347_p6  ;;  %p352_p13 = por %p351_p10, %p350_p4 }
  0x1f   : > { %p354_p1 = por %p353_p12, %p352_p13 }
  0x21   : > { %p355_p2 = pnand %p354_p1, %p348_p7 }
  0x23   : > { %358 = shalt.err (!%p355_p2)
}
  0x24   : > { %s359_s20 = scalar_lea.vmem %s550_s5, 128  ;;  %s458_s21 = smov [#allocation4]  }
  0x25   : > { %p360_p3 = scmp.ne.s32.totalorder %s550_s5, %s359_s20  ;;  %s364_s26 = sshll.u32 %s458_s21, 4  ;;  %s365_s26 = int_to_ptr.vmem [resolvable:$false] %s364_s26 }
  0x26   : > { %s366_s27 = scalar_lea.vmem %s365_s26, 256  ;;  %p367_p9 = scmp.lt.s32.totalorder %s550_s5, %s365_s26 }
  0x27   : > { %p362_p6 = pnand %p360_p3, %p346_p5  ;;  %p368_p4 = scmp.lt.s32.totalorder %s366_s27, %s359_s20 }
  0x29   : > { %p363_p11 = pneg %p362_p6  ;;  %p369_p10 = por %p368_p4, %p367_p9 }
  0x2b   : > { %p370_p12 = pnand %p369_p10, %p363_p11 }
  0x2d   : > { %373 = shalt.err (!%p370_p12)
}
  0x2e   : > { %288 = dma.hbm_to_vmem [thread:$0]  (!%p554_p0), %s548_s3, 128, %s550_s5, %s106_s7  }
  0x2f   : > { %p661_p1 = scmp.lt.s32.totalorder %s456_s16, 3  ;;  %p662_p2 = scmp.ge.s32.totalorder %s456_s16, 1 }
  0x31   : > { %p123_p5 = pnand %p662_p2, %p661_p1 }
  0x32   : > { %s590_s28 = sand.u32 (!%p123_p5), 1, %s440_s12  }
  0x33   : > { %126 = sbr.rel (%p123_p5) target bundleno = 106 (0x6a), region = 24  ;;  %s275_s29 = sshll.u32 (!%p123_p5), %s590_s28, 3 }
  0x34   : > { %s129_s30 = scalar_lea.sflag (!%p123_p5), [#allocation5], %s590_s28  ;;  %s132_s4 = scalar_lea.vmem (!%p123_p5), [#allocation4], %s275_s29 }
  0x3a   : > { %427 = dma.done.wait (%p526_p8), %s129_s30, 128  }
  0x3b   : > { %429 = vsyncadd (%p526_p8), %s129_s30, 4294967168  ;;  %v153_v0 = vstv %s448_s14  ;;  %s154_s3 = sld [smem:[#allocation3]]  ;;  %v151_v1 = vlaneseq  ;;  %v170_v16 = vld [vmem:[%s132_s4] sm:$0xff]  ;;  %s150_s22 = scalar_lea.vmem [#allocation7], %s275_s29  ;;  %v459_v17 = vmov 0.0  }
  0x3c   : > { %v155_v2 = vmul.u32 2654435769, %v153_v0  ;;  %s188_s5 = sshll.u32 %s150_s22, 4  ;;  %s278_s6 = sshll.u32 %s448_s14, 7  ;;  %s600_s5 = int_to_ptr.vmem [resolvable:$true] %s188_s5 }
  0x3d   : > { %v152_v3 = vand.u32 127, %v151_v1  ;;  %s605_s9 = scalar_lea.hbm %s654_s2, %s278_s6  ;;  %s174_s10 = scalar_lea.sflag [#allocation6], %s590_s28 }
  0x3e   : > { %s374_s0 = scalar_lea.vmem %s600_s5, 128  ;;  %p663_p9 = scmp.ne.s32.totalorder %s658_s23, 0 }
  0x3f   : > { %p375_p8 = scmp.ne.s32.totalorder %s600_s5, %s374_s0  ;;  %s460_s14 = smov [#allocation7]  }
  0x40   : > { %s378_s17 = sshll.u32 %s460_s14, 4  ;;  %s379_s17 = int_to_ptr.vmem [resolvable:$false] %s378_s17 }
  0x41   : > { %v156_v4 = vstv %s154_s3  ;;  %p376_p11 = pnand %p375_p8, %p663_p9  ;;  %s380_s19 = scalar_lea.vmem %s379_s17, 256 }
  0x42   : > { %v157_v5 = vadd.s32 %v156_v4, %v155_v2  ;;  %p381_p7 = scmp.lt.s32.totalorder %s600_s5, %s379_s17  ;;  %p382_p13 = scmp.lt.s32.totalorder %s380_s19, %s374_s0 }
  0x43   : > { %p377_p0 = pneg %p376_p11 }
  0x44   : > { %v158_v6 = vxor.u32 %v157_v5, %v152_v3  ;;  %p383_p3 = por %p382_p13, %p381_p7 }
  0x46   : > { %v159_v7 = vshrl.u32 %v158_v6, 16  ;;  %p384_p6 = pnand %p383_p3, %p377_p0 }
  0x48   : > { %v160_v8 = vxor.u32 %v159_v7, %v158_v6 }
  0x4a   : > { %v161_v9 = vmul.u32 2246822507, %v160_v8 }
  0x4c   : > { %v162_v10 = vshrl.u32 %v161_v9, 13 }
  0x4e   : > { %v163_v11 = vxor.u32 %v162_v10, %v161_v9 }
  0x50   : > { %v164_v12 = vmul.u32 3266489909, %v163_v11 }
  0x52   : > { %v165_v13 = vshrl.u32 %v164_v12, 16 }
  0x54   : > { %v166_v14 = vxor.u32 %v165_v13, %v164_v12 }
  0x56   : > { %v167_v15 = vand.u32 16777215, %v166_v14 }
  0x58   : > { %vm168_vm0 = vcmp.ge.u32.totalorder %v167_v15, 5033165 }
  0x59   : > { %v169_v18 = vsel %vm168_vm0, 1.4285715, %v459_v17 }
  0x5a   : > { %v171_v19 = vmul.f32 %v170_v16, %v169_v18 }
  0x5c   : > { %172 = vst [vmem:[%s150_s22] sm:$0xff] %v171_v19 }
  0x5d   : > { %387 = shalt.err (!%p384_p6)
}
  0x5e   : > { %s388_s20 = scalar_lea.hbm %s605_s9, 128  ;;  %s392_s27 = scalar_lea.hbm %s654_s2, 256 }
  0x5f   : > { %p389_p4 = scmp.ne.s32.totalorder %s605_s9, %s388_s20  ;;  %p393_p1 = scmp.lt.u32.totalorder %s605_s9, %s654_s2 }
  0x60   : > { %p394_p2 = scmp.lt.u32.totalorder %s392_s27, %s388_s20  ;;  %p396_p8 = scmp.lt.u32.totalorder %s388_s20, %s605_s9 }
  0x61   : > { %p390_p10 = pnand %p389_p4, %p663_p9 }
  0x62   : > { %p395_p5 = por %p394_p2, %p393_p1 }
  0x63   : > { %p391_p12 = pneg %p390_p10 }
  0x64   : > { %p397_p11 = por %p396_p8, %p395_p5 }
  0x66   : > { %p398_p0 = pnand %p397_p11, %p391_p12 }
  0x68   : > { %401 = shalt.err (!%p398_p0)
}
  0x69   : > { %283 = dma.vmem_to_hbm [thread:$0]  (%p663_p9), %s600_s5, 128, %s605_s9, %s174_s10  }
  0x6a PF: > { %s200_s30 = sand.u32 1, %s436_s11   ;;  %p664_p7 = scmp.ne.s32.totalorder %s659_s25, 0 }
  0x6b   : > { %p665_p13 = scmp.ge.s32.totalorder %s456_s16, 2  ;;  %s201_s4 = scalar_lea.sflag [#allocation6], %s200_s30 }
  0x6d   : > { %p290_p3 = pnand %p665_p13, %p664_p7 }
  0x6f   : > { %431 = dma.done.wait (!%p290_p3), %s201_s4, 128  }
  0x70   : > { %433 = vsyncadd (!%p290_p3), %s201_s4, 4294967168  ;;  %s19_s16 = sadd.s32 1, %s456_s16   ;;  %s666_s11 = smov %s440_s12 }
  0x71   : > { %p16_p6 = scmp.ge.s32.totalorder %s19_s16, 4   ;;  %s667_s12 = smov %s444_s13 }
  0x72   : > { %s668_s13 = smov %s535_s24  ;;  %s669_s14 = smov %s452_s15 }
  0x73   : > { %s670_s15 = smov %s672_s18  ;;  %18 = sbr.rel (!%p16_p6) target bundleno = 8 (0x8), region = 69 }
  0x7a   :  { %206 = vsyncpa [#allocation5], 1 }
  0x7b   :  { %208 = vsyncpa [#allocation5 + $0x1], 1 }
  0x7c   :  { %209 = vsyncpa [#allocation6], 1 }
  0x7d   :  { %211 = vsyncpa [#allocation6 + $0x1], 1 }

</bundles_post_ra>
